<compile_context>
chip_gen: v5e
topology: v5e:2x2
jax: 0.10.0
libtpu: 0.0.40
codegen_flags: <defaults>
</compile_context>

<pallas_src>
import functools

import jax
import jax.numpy as jnp
from jax.experimental import pallas as pl
from jax.experimental.pallas import tpu as pltpu

_MIN_KERNEL_BYTES = 1 << 20   # below this, pallas_call overhead dominates the copy
_MULTI_DMA_BYTES = 4 << 20    # above this, split the copy into several descriptors


def _identity_alias_kernel(x_hbm_ref, o_hbm_ref):
    # Output buffer IS the input buffer (input_output_aliases={0: 0}); the
    # data is already where it needs to be: zero bytes moved, no VMEM, no DMA,
    # no compute slots used at all.
    del x_hbm_ref, o_hbm_ref


def _identity_copy_kernel(x_hbm_ref, o_hbm_ref, copy_sems, *, num_chunks, chunk):
    # Materialized copy: stream HBM -> HBM directly (no VMEM round-trip).
    if num_chunks == 1:
        cp = pltpu.make_async_copy(x_hbm_ref, o_hbm_ref, copy_sems.at[0])
        cp.start()
        cp.wait()
        return
    # Keep several DMAs in flight: issue every descriptor back-to-back, then
    # wait on all of them.  Hides per-descriptor issue latency and uses more
    # DMA queues for large copies; still a single program (no grid steps).
    copies = []
    for i in range(num_chunks):                      # static Python unroll
        sl = pl.ds(i * chunk, chunk)
        cp = pltpu.make_async_copy(x_hbm_ref.at[sl], o_hbm_ref.at[sl],
                                   copy_sems.at[i])
        cp.start()
        copies.append(cp)
    for cp in copies:
        cp.wait()


def _materialized_copy(x: jax.Array) -> jax.Array:
    nbytes = x.size * x.dtype.itemsize
    lead = x.shape[0] if x.ndim >= 1 else 1
    num_chunks = 1
    if x.ndim >= 1 and nbytes >= _MULTI_DMA_BYTES:
        for k in (8, 4, 2):
            if lead % k == 0 and (nbytes // k) >= _MIN_KERNEL_BYTES:
                num_chunks = k
                break
    chunk = lead // num_chunks if num_chunks > 1 else lead
    kernel = functools.partial(_identity_copy_kernel,
                               num_chunks=num_chunks, chunk=chunk)
    return pl.pallas_call(
        kernel,
        out_shape=jax.ShapeDtypeStruct(x.shape, x.dtype),
        # Both operands stay in place (HBM); the kernel drives the DMA itself.
        in_specs=[pl.BlockSpec(memory_space=pl.ANY)],
        out_specs=pl.BlockSpec(memory_space=pl.ANY),
        scratch_shapes=[pltpu.SemaphoreType.DMA((num_chunks,))],
        # Real cost for XLA's scheduler: one full HBM read + one full write.
        cost_estimate=pl.CostEstimate(flops=0, transcendentals=0,
                                      bytes_accessed=2 * nbytes),
    )(x)


def _aliased_identity(x: jax.Array) -> jax.Array:
    return pl.pallas_call(
        _identity_alias_kernel,
        out_shape=jax.ShapeDtypeStruct(x.shape, x.dtype),
        in_specs=[pl.BlockSpec(memory_space=pl.ANY)],
        out_specs=pl.BlockSpec(memory_space=pl.ANY),
        input_output_aliases={0: 0},        # output buffer = input buffer
    )(x)


def identity_pallas(x: jax.Array, *, copy: bool = False) -> jax.Array:
    """Identity.forward(x) = x.

    copy=False (default): zero-copy.  Tiny / empty tensors are returned
      directly; larger tensors go through an aliased Pallas call that moves
      zero bytes.  (If the caller keeps using x, XLA inserts one defensive
      copy -- still correct, just not free.)
    copy=True: always materializes a fresh output buffer via HBM->HBM DMA at
      the copy roofline (1 read + 1 write), never staging through VMEM.
    """
    nbytes = x.size * x.dtype.itemsize
    if x.size == 0:
        return x                            # zero-element guard: nothing to move
    if copy:
        return _materialized_copy(x)
    if nbytes < _MIN_KERNEL_BYTES:
        return x                            # launch latency >> copy time here
    try:
        return _aliased_identity(x)
    except Exception:
        # Defensive fallback: if buffer aliasing is unavailable in this
        # environment, fall back to the proven materialized DMA copy.
        return _materialized_copy(x)


if __name__ == "__main__":
    key = jax.random.PRNGKey(0)
    k1, k2 = jax.random.split(key)

    # Canonical small NCHW input for a feature-extraction Identity head.
    # At 8 KiB this takes the bypass path (identity is returned directly).
    x_small = jax.random.normal(k1, (2, 4, 16, 16), dtype=jnp.float32)
    y_small = identity_pallas(x_small)
    jax.block_until_ready(y_small)
    assert y_small.shape == x_small.shape and y_small.dtype == x_small.dtype
    assert bool(jnp.array_equal(y_small, x_small))

    # Larger NCHW batch (8 MiB) to exercise both Pallas kernel paths:
    #   * aliased zero-copy kernel (default)
    #   * materialized multi-descriptor HBM->HBM DMA copy (copy=True)
    x_big = jax.random.normal(k2, (8, 4, 256, 256), dtype=jnp.float32)
    y_alias = identity_pallas(x_big)
    y_copy = identity_pallas(x_big, copy=True)
    jax.block_until_ready((y_alias, y_copy))
    assert y_alias.shape == x_big.shape and y_alias.dtype == x_big.dtype
    assert y_copy.shape == x_big.shape and y_copy.dtype == x_big.dtype
    assert bool(jnp.array_equal(y_alias, x_big))
    assert bool(jnp.array_equal(y_copy, x_big))

    print("KERNEL_OK")
</pallas_src>

<mosaic_0001>
module attributes {stable_mosaic.version = 11 : i64} {
  func.func @_identity_alias_kernel(%arg0: memref<8x4x256x256xf32, #tpu.memory_space<any>>, %arg1: memref<8x4x256x256xf32, #tpu.memory_space<any>>) attributes {dimension_semantics = [], scalar_prefetch = 0 : i64, scratch_operands = 0 : i64, tpu.core_type = #tpu.core_type<tc>} {
    return
  }
}

module attributes {stable_mosaic.version = 11 : i64} {
  func.func @_identity_copy_kernel(%arg0: memref<8x4x256x256xf32, #tpu.memory_space<any>>, %arg1: memref<8x4x256x256xf32, #tpu.memory_space<any>>, %arg2: memref<8x!tpu.dma_semaphore, #tpu.memory_space<semaphore_mem>>) attributes {dimension_semantics = [], scalar_prefetch = 0 : i64, scratch_operands = 1 : i64, tpu.core_type = #tpu.core_type<tc>} {
    %c0_i32 = arith.constant 0 : i32
    %c0_i32_0 = arith.constant 0 : i32
    %c0_i32_1 = arith.constant 0 : i32
    %c0_i32_2 = arith.constant 0 : i32
    %c0_i32_3 = arith.constant 0 : i32
    %0 = tpu.memref_slice %arg0[%c0_i32_0, %c0_i32_1, %c0_i32_2, %c0_i32_3] : memref<8x4x256x256xf32, #tpu.memory_space<any>> -> memref<1x4x256x256xf32, #tpu.memory_space<any>>
    %c0_i32_4 = arith.constant 0 : i32
    %c0_i32_5 = arith.constant 0 : i32
    %c0_i32_6 = arith.constant 0 : i32
    %c0_i32_7 = arith.constant 0 : i32
    %1 = tpu.memref_slice %arg1[%c0_i32_4, %c0_i32_5, %c0_i32_6, %c0_i32_7] : memref<8x4x256x256xf32, #tpu.memory_space<any>> -> memref<1x4x256x256xf32, #tpu.memory_space<any>>
    %2 = tpu.memref_slice %arg2[%c0_i32] : memref<8x!tpu.dma_semaphore, #tpu.memory_space<semaphore_mem>> -> memref<1x!tpu.dma_semaphore, #tpu.memory_space<semaphore_mem>>
    %3 = tpu.memref_squeeze %2 : memref<1x!tpu.dma_semaphore, #tpu.memory_space<semaphore_mem>> -> memref<!tpu.dma_semaphore, #tpu.memory_space<semaphore_mem>>
    tpu.enqueue_dma source(%0 : memref<1x4x256x256xf32, #tpu.memory_space<any>>) target(%1 : memref<1x4x256x256xf32, #tpu.memory_space<any>>) target_semaphore(%3 : memref<!tpu.dma_semaphore, #tpu.memory_space<semaphore_mem>>)
    %c1_i32 = arith.constant 1 : i32
    %c1_i32_8 = arith.constant 1 : i32
    %c0_i32_9 = arith.constant 0 : i32
    %c0_i32_10 = arith.constant 0 : i32
    %c0_i32_11 = arith.constant 0 : i32
    %4 = tpu.memref_slice %arg0[%c1_i32_8, %c0_i32_9, %c0_i32_10, %c0_i32_11] : memref<8x4x256x256xf32, #tpu.memory_space<any>> -> memref<1x4x256x256xf32, #tpu.memory_space<any>>
    %c1_i32_12 = arith.constant 1 : i32
    %c0_i32_13 = arith.constant 0 : i32
    %c0_i32_14 = arith.constant 0 : i32
    %c0_i32_15 = arith.constant 0 : i32
    %5 = tpu.memref_slice %arg1[%c1_i32_12, %c0_i32_13, %c0_i32_14, %c0_i32_15] : memref<8x4x256x256xf32, #tpu.memory_space<any>> -> memref<1x4x256x256xf32, #tpu.memory_space<any>>
    %6 = tpu.memref_slice %arg2[%c1_i32] : memref<8x!tpu.dma_semaphore, #tpu.memory_space<semaphore_mem>> -> memref<1x!tpu.dma_semaphore, #tpu.memory_space<semaphore_mem>>
    %7 = tpu.memref_squeeze %6 : memref<1x!tpu.dma_semaphore, #tpu.memory_space<semaphore_mem>> -> memref<!tpu.dma_semaphore, #tpu.memory_space<semaphore_mem>>
    tpu.enqueue_dma source(%4 : memref<1x4x256x256xf32, #tpu.memory_space<any>>) target(%5 : memref<1x4x256x256xf32, #tpu.memory_space<any>>) target_semaphore(%7 : memref<!tpu.dma_semaphore, #tpu.memory_space<semaphore_mem>>)
    %c2_i32 = arith.constant 2 : i32
    %c2_i32_16 = arith.constant 2 : i32
    %c0_i32_17 = arith.constant 0 : i32
    %c0_i32_18 = arith.constant 0 : i32
    %c0_i32_19 = arith.constant 0 : i32
    %8 = tpu.memref_slice %arg0[%c2_i32_16, %c0_i32_17, %c0_i32_18, %c0_i32_19] : memref<8x4x256x256xf32, #tpu.memory_space<any>> -> memref<1x4x256x256xf32, #tpu.memory_space<any>>
    %c2_i32_20 = arith.constant 2 : i32
    %c0_i32_21 = arith.constant 0 : i32
    %c0_i32_22 = arith.constant 0 : i32
    %c0_i32_23 = arith.constant 0 : i32
    %9 = tpu.memref_slice %arg1[%c2_i32_20, %c0_i32_21, %c0_i32_22, %c0_i32_23] : memref<8x4x256x256xf32, #tpu.memory_space<any>> -> memref<1x4x256x256xf32, #tpu.memory_space<any>>
    %10 = tpu.memref_slice %arg2[%c2_i32] : memref<8x!tpu.dma_semaphore, #tpu.memory_space<semaphore_mem>> -> memref<1x!tpu.dma_semaphore, #tpu.memory_space<semaphore_mem>>
    %11 = tpu.memref_squeeze %10 : memref<1x!tpu.dma_semaphore, #tpu.memory_space<semaphore_mem>> -> memref<!tpu.dma_semaphore, #tpu.memory_space<semaphore_mem>>
    tpu.enqueue_dma source(%8 : memref<1x4x256x256xf32, #tpu.memory_space<any>>) target(%9 : memref<1x4x256x256xf32, #tpu.memory_space<any>>) target_semaphore(%11 : memref<!tpu.dma_semaphore, #tpu.memory_space<semaphore_mem>>)
    %c3_i32 = arith.constant 3 : i32
    %c3_i32_24 = arith.constant 3 : i32
    %c0_i32_25 = arith.constant 0 : i32
    %c0_i32_26 = arith.constant 0 : i32
    %c0_i32_27 = arith.constant 0 : i32
    %12 = tpu.memref_slice %arg0[%c3_i32_24, %c0_i32_25, %c0_i32_26, %c0_i32_27] : memref<8x4x256x256xf32, #tpu.memory_space<any>> -> memref<1x4x256x256xf32, #tpu.memory_space<any>>
    %c3_i32_28 = arith.constant 3 : i32
    %c0_i32_29 = arith.constant 0 : i32
    %c0_i32_30 = arith.constant 0 : i32
    %c0_i32_31 = arith.constant 0 : i32
    %13 = tpu.memref_slice %arg1[%c3_i32_28, %c0_i32_29, %c0_i32_30, %c0_i32_31] : memref<8x4x256x256xf32, #tpu.memory_space<any>> -> memref<1x4x256x256xf32, #tpu.memory_space<any>>
    %14 = tpu.memref_slice %arg2[%c3_i32] : memref<8x!tpu.dma_semaphore, #tpu.memory_space<semaphore_mem>> -> memref<1x!tpu.dma_semaphore, #tpu.memory_space<semaphore_mem>>
    %15 = tpu.memref_squeeze %14 : memref<1x!tpu.dma_semaphore, #tpu.memory_space<semaphore_mem>> -> memref<!tpu.dma_semaphore, #tpu.memory_space<semaphore_mem>>
    tpu.enqueue_dma source(%12 : memref<1x4x256x256xf32, #tpu.memory_space<any>>) target(%13 : memref<1x4x256x256xf32, #tpu.memory_space<any>>) target_semaphore(%15 : memref<!tpu.dma_semaphore, #tpu.memory_space<semaphore_mem>>)
    %c4_i32 = arith.constant 4 : i32
    %c4_i32_32 = arith.constant 4 : i32
    %c0_i32_33 = arith.constant 0 : i32
    %c0_i32_34 = arith.constant 0 : i32
    %c0_i32_35 = arith.constant 0 : i32
    %16 = tpu.memref_slice %arg0[%c4_i32_32, %c0_i32_33, %c0_i32_34, %c0_i32_35] : memref<8x4x256x256xf32, #tpu.memory_space<any>> -> memref<1x4x256x256xf32, #tpu.memory_space<any>>
    %c4_i32_36 = arith.constant 4 : i32
    %c0_i32_37 = arith.constant 0 : i32
    %c0_i32_38 = arith.constant 0 : i32
    %c0_i32_39 = arith.constant 0 : i32
    %17 = tpu.memref_slice %arg1[%c4_i32_36, %c0_i32_37, %c0_i32_38, %c0_i32_39] : memref<8x4x256x256xf32, #tpu.memory_space<any>> -> memref<1x4x256x256xf32, #tpu.memory_space<any>>
    %18 = tpu.memref_slice %arg2[%c4_i32] : memref<8x!tpu.dma_semaphore, #tpu.memory_space<semaphore_mem>> -> memref<1x!tpu.dma_semaphore, #tpu.memory_space<semaphore_mem>>
    %19 = tpu.memref_squeeze %18 : memref<1x!tpu.dma_semaphore, #tpu.memory_space<semaphore_mem>> -> memref<!tpu.dma_semaphore, #tpu.memory_space<semaphore_mem>>
    tpu.enqueue_dma source(%16 : memref<1x4x256x256xf32, #tpu.memory_space<any>>) target(%17 : memref<1x4x256x256xf32, #tpu.memory_space<any>>) target_semaphore(%19 : memref<!tpu.dma_semaphore, #tpu.memory_space<semaphore_mem>>)
    %c5_i32 = arith.constant 5 : i32
    %c5_i32_40 = arith.constant 5 : i32
    %c0_i32_41 = arith.constant 0 : i32
    %c0_i32_42 = arith.constant 0 : i32
    %c0_i32_43 = arith.constant 0 : i32
    %20 = tpu.memref_slice %arg0[%c5_i32_40, %c0_i32_41, %c0_i32_42, %c0_i32_43] : memref<8x4x256x256xf32, #tpu.memory_space<any>> -> memref<1x4x256x256xf32, #tpu.memory_space<any>>
    %c5_i32_44 = arith.constant 5 : i32
    %c0_i32_45 = arith.constant 0 : i32
    %c0_i32_46 = arith.constant 0 : i32
    %c0_i32_47 = arith.constant 0 : i32
    %21 = tpu.memref_slice %arg1[%c5_i32_44, %c0_i32_45, %c0_i32_46, %c0_i32_47] : memref<8x4x256x256xf32, #tpu.memory_space<any>> -> memref<1x4x256x256xf32, #tpu.memory_space<any>>
    %22 = tpu.memref_slice %arg2[%c5_i32] : memref<8x!tpu.dma_semaphore, #tpu.memory_space<semaphore_mem>> -> memref<1x!tpu.dma_semaphore, #tpu.memory_space<semaphore_mem>>
    %23 = tpu.memref_squeeze %22 : memref<1x!tpu.dma_semaphore, #tpu.memory_space<semaphore_mem>> -> memref<!tpu.dma_semaphore, #tpu.memory_space<semaphore_mem>>
    tpu.enqueue_dma source(%20 : memref<1x4x256x256xf32, #tpu.memory_space<any>>) target(%21 : memref<1x4x256x256xf32, #tpu.memory_space<any>>) target_semaphore(%23 : memref<!tpu.dma_semaphore, #tpu.memory_space<semaphore_mem>>)
    %c6_i32 = arith.constant 6 : i32
    %c6_i32_48 = arith.constant 6 : i32
    %c0_i32_49 = arith.constant 0 : i32
    %c0_i32_50 = arith.constant 0 : i32
    %c0_i32_51 = arith.constant 0 : i32
    %24 = tpu.memref_slice %arg0[%c6_i32_48, %c0_i32_49, %c0_i32_50, %c0_i32_51] : memref<8x4x256x256xf32, #tpu.memory_space<any>> -> memref<1x4x256x256xf32, #tpu.memory_space<any>>
    %c6_i32_52 = arith.constant 6 : i32
    %c0_i32_53 = arith.constant 0 : i32
    %c0_i32_54 = arith.constant 0 : i32
    %c0_i32_55 = arith.constant 0 : i32
    %25 = tpu.memref_slice %arg1[%c6_i32_52, %c0_i32_53, %c0_i32_54, %c0_i32_55] : memref<8x4x256x256xf32, #tpu.memory_space<any>> -> memref<1x4x256x256xf32, #tpu.memory_space<any>>
    %26 = tpu.memref_slice %arg2[%c6_i32] : memref<8x!tpu.dma_semaphore, #tpu.memory_space<semaphore_mem>> -> memref<1x!tpu.dma_semaphore, #tpu.memory_space<semaphore_mem>>
    %27 = tpu.memref_squeeze %26 : memref<1x!tpu.dma_semaphore, #tpu.memory_space<semaphore_mem>> -> memref<!tpu.dma_semaphore, #tpu.memory_space<semaphore_mem>>
    tpu.enqueue_dma source(%24 : memref<1x4x256x256xf32, #tpu.memory_space<any>>) target(%25 : memref<1x4x256x256xf32, #tpu.memory_space<any>>) target_semaphore(%27 : memref<!tpu.dma_semaphore, #tpu.memory_space<semaphore_mem>>)
    %c7_i32 = arith.constant 7 : i32
    %c7_i32_56 = arith.constant 7 : i32
    %c0_i32_57 = arith.constant 0 : i32
    %c0_i32_58 = arith.constant 0 : i32
    %c0_i32_59 = arith.constant 0 : i32
    %28 = tpu.memref_slice %arg0[%c7_i32_56, %c0_i32_57, %c0_i32_58, %c0_i32_59] : memref<8x4x256x256xf32, #tpu.memory_space<any>> -> memref<1x4x256x256xf32, #tpu.memory_space<any>>
    %c7_i32_60 = arith.constant 7 : i32
    %c0_i32_61 = arith.constant 0 : i32
    %c0_i32_62 = arith.constant 0 : i32
    %c0_i32_63 = arith.constant 0 : i32
    %29 = tpu.memref_slice %arg1[%c7_i32_60, %c0_i32_61, %c0_i32_62, %c0_i32_63] : memref<8x4x256x256xf32, #tpu.memory_space<any>> -> memref<1x4x256x256xf32, #tpu.memory_space<any>>
    %30 = tpu.memref_slice %arg2[%c7_i32] : memref<8x!tpu.dma_semaphore, #tpu.memory_space<semaphore_mem>> -> memref<1x!tpu.dma_semaphore, #tpu.memory_space<semaphore_mem>>
    %31 = tpu.memref_squeeze %30 : memref<1x!tpu.dma_semaphore, #tpu.memory_space<semaphore_mem>> -> memref<!tpu.dma_semaphore, #tpu.memory_space<semaphore_mem>>
    tpu.enqueue_dma source(%28 : memref<1x4x256x256xf32, #tpu.memory_space<any>>) target(%29 : memref<1x4x256x256xf32, #tpu.memory_space<any>>) target_semaphore(%31 : memref<!tpu.dma_semaphore, #tpu.memory_space<semaphore_mem>>)
    %c0_i32_64 = arith.constant 0 : i32
    %c0_i32_65 = arith.constant 0 : i32
    %c0_i32_66 = arith.constant 0 : i32
    %c0_i32_67 = arith.constant 0 : i32
    %c0_i32_68 = arith.constant 0 : i32
    %32 = tpu.memref_slice %arg0[%c0_i32_65, %c0_i32_66, %c0_i32_67, %c0_i32_68] : memref<8x4x256x256xf32, #tpu.memory_space<any>> -> memref<1x4x256x256xf32, #tpu.memory_space<any>>
    %c0_i32_69 = arith.constant 0 : i32
    %c0_i32_70 = arith.constant 0 : i32
    %c0_i32_71 = arith.constant 0 : i32
    %c0_i32_72 = arith.constant 0 : i32
    %33 = tpu.memref_slice %arg1[%c0_i32_69, %c0_i32_70, %c0_i32_71, %c0_i32_72] : memref<8x4x256x256xf32, #tpu.memory_space<any>> -> memref<1x4x256x256xf32, #tpu.memory_space<any>>
    %34 = tpu.memref_slice %arg2[%c0_i32_64] : memref<8x!tpu.dma_semaphore, #tpu.memory_space<semaphore_mem>> -> memref<1x!tpu.dma_semaphore, #tpu.memory_space<semaphore_mem>>
    %35 = tpu.memref_squeeze %34 : memref<1x!tpu.dma_semaphore, #tpu.memory_space<semaphore_mem>> -> memref<!tpu.dma_semaphore, #tpu.memory_space<semaphore_mem>>
    tpu.wait_dma2 semaphore(%35 : memref<!tpu.dma_semaphore, #tpu.memory_space<semaphore_mem>>) src(%32 : memref<1x4x256x256xf32, #tpu.memory_space<any>>) dst(%33 : memref<1x4x256x256xf32, #tpu.memory_space<any>>)
    %c1_i32_73 = arith.constant 1 : i32
    %c1_i32_74 = arith.constant 1 : i32
    %c0_i32_75 = arith.constant 0 : i32
    %c0_i32_76 = arith.constant 0 : i32
    %c0_i32_77 = arith.constant 0 : i32
    %36 = tpu.memref_slice %arg0[%c1_i32_74, %c0_i32_75, %c0_i32_76, %c0_i32_77] : memref<8x4x256x256xf32, #tpu.memory_space<any>> -> memref<1x4x256x256xf32, #tpu.memory_space<any>>
    %c1_i32_78 = arith.constant 1 : i32
    %c0_i32_79 = arith.constant 0 : i32
    %c0_i32_80 = arith.constant 0 : i32
    %c0_i32_81 = arith.constant 0 : i32
    %37 = tpu.memref_slice %arg1[%c1_i32_78, %c0_i32_79, %c0_i32_80, %c0_i32_81] : memref<8x4x256x256xf32, #tpu.memory_space<any>> -> memref<1x4x256x256xf32, #tpu.memory_space<any>>
    %38 = tpu.memref_slice %arg2[%c1_i32_73] : memref<8x!tpu.dma_semaphore, #tpu.memory_space<semaphore_mem>> -> memref<1x!tpu.dma_semaphore, #tpu.memory_space<semaphore_mem>>
    %39 = tpu.memref_squeeze %38 : memref<1x!tpu.dma_semaphore, #tpu.memory_space<semaphore_mem>> -> memref<!tpu.dma_semaphore, #tpu.memory_space<semaphore_mem>>
    tpu.wait_dma2 semaphore(%39 : memref<!tpu.dma_semaphore, #tpu.memory_space<semaphore_mem>>) src(%36 : memref<1x4x256x256xf32, #tpu.memory_space<any>>) dst(%37 : memref<1x4x256x256xf32, #tpu.memory_space<any>>)
    %c2_i32_82 = arith.constant 2 : i32
    %c2_i32_83 = arith.constant 2 : i32
    %c0_i32_84 = arith.constant 0 : i32
    %c0_i32_85 = arith.constant 0 : i32
    %c0_i32_86 = arith.constant 0 : i32
    %40 = tpu.memref_slice %arg0[%c2_i32_83, %c0_i32_84, %c0_i32_85, %c0_i32_86] : memref<8x4x256x256xf32, #tpu.memory_space<any>> -> memref<1x4x256x256xf32, #tpu.memory_space<any>>
    %c2_i32_87 = arith.constant 2 : i32
    %c0_i32_88 = arith.constant 0 : i32
    %c0_i32_89 = arith.constant 0 : i32
    %c0_i32_90 = arith.constant 0 : i32
    %41 = tpu.memref_slice %arg1[%c2_i32_87, %c0_i32_88, %c0_i32_89, %c0_i32_90] : memref<8x4x256x256xf32, #tpu.memory_space<any>> -> memref<1x4x256x256xf32, #tpu.memory_space<any>>
    %42 = tpu.memref_slice %arg2[%c2_i32_82] : memref<8x!tpu.dma_semaphore, #tpu.memory_space<semaphore_mem>> -> memref<1x!tpu.dma_semaphore, #tpu.memory_space<semaphore_mem>>
    %43 = tpu.memref_squeeze %42 : memref<1x!tpu.dma_semaphore, #tpu.memory_space<semaphore_mem>> -> memref<!tpu.dma_semaphore, #tpu.memory_space<semaphore_mem>>
    tpu.wait_dma2 semaphore(%43 : memref<!tpu.dma_semaphore, #tpu.memory_space<semaphore_mem>>) src(%40 : memref<1x4x256x256xf32, #tpu.memory_space<any>>) dst(%41 : memref<1x4x256x256xf32, #tpu.memory_space<any>>)
    %c3_i32_91 = arith.constant 3 : i32
    %c3_i32_92 = arith.constant 3 : i32
    %c0_i32_93 = arith.constant 0 : i32
    %c0_i32_94 = arith.constant 0 : i32
    %c0_i32_95 = arith.constant 0 : i32
    %44 = tpu.memref_slice %arg0[%c3_i32_92, %c0_i32_93, %c0_i32_94, %c0_i32_95] : memref<8x4x256x256xf32, #tpu.memory_space<any>> -> memref<1x4x256x256xf32, #tpu.memory_space<any>>
    %c3_i32_96 = arith.constant 3 : i32
    %c0_i32_97 = arith.constant 0 : i32
    %c0_i32_98 = arith.constant 0 : i32
    %c0_i32_99 = arith.constant 0 : i32
    %45 = tpu.memref_slice %arg1[%c3_i32_96, %c0_i32_97, %c0_i32_98, %c0_i32_99] : memref<8x4x256x256xf32, #tpu.memory_space<any>> -> memref<1x4x256x256xf32, #tpu.memory_space<any>>
    %46 = tpu.memref_slice %arg2[%c3_i32_91] : memref<8x!tpu.dma_semaphore, #tpu.memory_space<semaphore_mem>> -> memref<1x!tpu.dma_semaphore, #tpu.memory_space<semaphore_mem>>
    %47 = tpu.memref_squeeze %46 : memref<1x!tpu.dma_semaphore, #tpu.memory_space<semaphore_mem>> -> memref<!tpu.dma_semaphore, #tpu.memory_space<semaphore_mem>>
    tpu.wait_dma2 semaphore(%47 : memref<!tpu.dma_semaphore, #tpu.memory_space<semaphore_mem>>) src(%44 : memref<1x4x256x256xf32, #tpu.memory_space<any>>) dst(%45 : memref<1x4x256x256xf32, #tpu.memory_space<any>>)
    %c4_i32_100 = arith.constant 4 : i32
    %c4_i32_101 = arith.constant 4 : i32
    %c0_i32_102 = arith.constant 0 : i32
    %c0_i32_103 = arith.constant 0 : i32
    %c0_i32_104 = arith.constant 0 : i32
    %48 = tpu.memref_slice %arg0[%c4_i32_101, %c0_i32_102, %c0_i32_103, %c0_i32_104] : memref<8x4x256x256xf32, #tpu.memory_space<any>> -> memref<1x4x256x256xf32, #tpu.memory_space<any>>
    %c4_i32_105 = arith.constant 4 : i32
    %c0_i32_106 = arith.constant 0 : i32
    %c0_i32_107 = arith.constant 0 : i32
    %c0_i32_108 = arith.constant 0 : i32
    %49 = tpu.memref_slice %arg1[%c4_i32_105, %c0_i32_106, %c0_i32_107, %c0_i32_108] : memref<8x4x256x256xf32, #tpu.memory_space<any>> -> memref<1x4x256x256xf32, #tpu.memory_space<any>>
    %50 = tpu.memref_slice %arg2[%c4_i32_100] : memref<8x!tpu.dma_semaphore, #tpu.memory_space<semaphore_mem>> -> memref<1x!tpu.dma_semaphore, #tpu.memory_space<semaphore_mem>>
    %51 = tpu.memref_squeeze %50 : memref<1x!tpu.dma_semaphore, #tpu.memory_space<semaphore_mem>> -> memref<!tpu.dma_semaphore, #tpu.memory_space<semaphore_mem>>
    tpu.wait_dma2 semaphore(%51 : memref<!tpu.dma_semaphore, #tpu.memory_space<semaphore_mem>>) src(%48 : memref<1x4x256x256xf32, #tpu.memory_space<any>>) dst(%49 : memref<1x4x256x256xf32, #tpu.memory_space<any>>)
    %c5_i32_109 = arith.constant 5 : i32
    %c5_i32_110 = arith.constant 5 : i32
    %c0_i32_111 = arith.constant 0 : i32
    %c0_i32_112 = arith.constant 0 : i32
    %c0_i32_113 = arith.constant 0 : i32
    %52 = tpu.memref_slice %arg0[%c5_i32_110, %c0_i32_111, %c0_i32_112, %c0_i32_113] : memref<8x4x256x256xf32, #tpu.memory_space<any>> -> memref<1x4x256x256xf32, #tpu.memory_space<any>>
    %c5_i32_114 = arith.constant 5 : i32
    %c0_i32_115 = arith.constant 0 : i32
    %c0_i32_116 = arith.constant 0 : i32
    %c0_i32_117 = arith.constant 0 : i32
    %53 = tpu.memref_slice %arg1[%c5_i32_114, %c0_i32_115, %c0_i32_116, %c0_i32_117] : memref<8x4x256x256xf32, #tpu.memory_space<any>> -> memref<1x4x256x256xf32, #tpu.memory_space<any>>
    %54 = tpu.memref_slice %arg2[%c5_i32_109] : memref<8x!tpu.dma_semaphore, #tpu.memory_space<semaphore_mem>> -> memref<1x!tpu.dma_semaphore, #tpu.memory_space<semaphore_mem>>
    %55 = tpu.memref_squeeze %54 : memref<1x!tpu.dma_semaphore, #tpu.memory_space<semaphore_mem>> -> memref<!tpu.dma_semaphore, #tpu.memory_space<semaphore_mem>>
    tpu.wait_dma2 semaphore(%55 : memref<!tpu.dma_semaphore, #tpu.memory_space<semaphore_mem>>) src(%52 : memref<1x4x256x256xf32, #tpu.memory_space<any>>) dst(%53 : memref<1x4x256x256xf32, #tpu.memory_space<any>>)
    %c6_i32_118 = arith.constant 6 : i32
    %c6_i32_119 = arith.constant 6 : i32
    %c0_i32_120 = arith.constant 0 : i32
    %c0_i32_121 = arith.constant 0 : i32
    %c0_i32_122 = arith.constant 0 : i32
    %56 = tpu.memref_slice %arg0[%c6_i32_119, %c0_i32_120, %c0_i32_121, %c0_i32_122] : memref<8x4x256x256xf32, #tpu.memory_space<any>> -> memref<1x4x256x256xf32, #tpu.memory_space<any>>
    %c6_i32_123 = arith.constant 6 : i32
    %c0_i32_124 = arith.constant 0 : i32
    %c0_i32_125 = arith.constant 0 : i32
    %c0_i32_126 = arith.constant 0 : i32
    %57 = tpu.memref_slice %arg1[%c6_i32_123, %c0_i32_124, %c0_i32_125, %c0_i32_126] : memref<8x4x256x256xf32, #tpu.memory_space<any>> -> memref<1x4x256x256xf32, #tpu.memory_space<any>>
    %58 = tpu.memref_slice %arg2[%c6_i32_118] : memref<8x!tpu.dma_semaphore, #tpu.memory_space<semaphore_mem>> -> memref<1x!tpu.dma_semaphore, #tpu.memory_space<semaphore_mem>>
    %59 = tpu.memref_squeeze %58 : memref<1x!tpu.dma_semaphore, #tpu.memory_space<semaphore_mem>> -> memref<!tpu.dma_semaphore, #tpu.memory_space<semaphore_mem>>
    tpu.wait_dma2 semaphore(%59 : memref<!tpu.dma_semaphore, #tpu.memory_space<semaphore_mem>>) src(%56 : memref<1x4x256x256xf32, #tpu.memory_space<any>>) dst(%57 : memref<1x4x256x256xf32, #tpu.memory_space<any>>)
    %c7_i32_127 = arith.constant 7 : i32
    %c7_i32_128 = arith.constant 7 : i32
    %c0_i32_129 = arith.constant 0 : i32
    %c0_i32_130 = arith.constant 0 : i32
    %c0_i32_131 = arith.constant 0 : i32
    %60 = tpu.memref_slice %arg0[%c7_i32_128, %c0_i32_129, %c0_i32_130, %c0_i32_131] : memref<8x4x256x256xf32, #tpu.memory_space<any>> -> memref<1x4x256x256xf32, #tpu.memory_space<any>>
    %c7_i32_132 = arith.constant 7 : i32
    %c0_i32_133 = arith.constant 0 : i32
    %c0_i32_134 = arith.constant 0 : i32
    %c0_i32_135 = arith.constant 0 : i32
    %61 = tpu.memref_slice %arg1[%c7_i32_132, %c0_i32_133, %c0_i32_134, %c0_i32_135] : memref<8x4x256x256xf32, #tpu.memory_space<any>> -> memref<1x4x256x256xf32, #tpu.memory_space<any>>
    %62 = tpu.memref_slice %arg2[%c7_i32_127] : memref<8x!tpu.dma_semaphore, #tpu.memory_space<semaphore_mem>> -> memref<1x!tpu.dma_semaphore, #tpu.memory_space<semaphore_mem>>
    %63 = tpu.memref_squeeze %62 : memref<1x!tpu.dma_semaphore, #tpu.memory_space<semaphore_mem>> -> memref<!tpu.dma_semaphore, #tpu.memory_space<semaphore_mem>>
    tpu.wait_dma2 semaphore(%63 : memref<!tpu.dma_semaphore, #tpu.memory_space<semaphore_mem>>) src(%60 : memref<1x4x256x256xf32, #tpu.memory_space<any>>) dst(%61 : memref<1x4x256x256xf32, #tpu.memory_space<any>>)
    return
  }
}

</mosaic_0001>

<bundles_post_ra>
// kernel: tpu_custom_call.1
= control target key start
LH: loop header
LB: loop body
LE: loop exit
PB: predicated region body
PF: predicated region fallthrough
CT: control target
= control target key end

     0   :  { %s16_s0 = inlined_call_operand.hbm [shape: f32[8,4,256,256], index: 0, kind: input, shape index: {}, may-alias: {0,1}]   ;;  %s17_s1 = inlined_call_operand.hbm [shape: f32[8,4,256,256], index: 1, kind: output, shape index: {}, may-alias: {0,1}]  }

// kernel: tpu_custom_call.1
= control target key start
LH: loop header
LB: loop body
LE: loop exit
PB: predicated region body
PF: predicated region fallthrough
CT: control target
= control target key end

     0   :  { %s231_s15 = smov [#allocation2]   ;;  %s232_s16 = smov [#allocation3]   ;;  %s314_s0 = inlined_call_operand.hbm [shape: f32[8,4,256,256], index: 0, kind: input, shape index: {}]   ;;  %s315_s1 = inlined_call_operand.hbm [shape: f32[8,4,256,256], index: 1, kind: output, shape index: {}]  }
   0x1   :  { %s10_s8 = sshll.u32 %s314_s0, 4  ;;  %s12_s11 = sshll.u32 %s315_s1, 4  ;;  %s11_s8 = int_to_ptr.hbm [resolvable:$true] %s10_s8  ;;  %s13_s11 = int_to_ptr.hbm [resolvable:$true] %s12_s11 }
   0x2   :  { %s17_s14 = scalar_lea.hbm %s314_s0, 2048  ;;  %s233_s17 = smov 0  }
   0x3   :  { %16 = dma.general %s11_s8, 32768, %s13_s11, %s231_s15, %s232_s16, [#allocation4], %s233_s17, 0  }
   0x4   :  { %s18_s20 = scalar_lea.hbm %s315_s1, 2048  ;;  %s24_s21 = sshll.u32 %s17_s14, 4  ;;  %s25_s21 = int_to_ptr.hbm [resolvable:$true] %s24_s21 }
   0x5   :  { %s26_s22 = sshll.u32 %s18_s20, 4  ;;  %s31_s25 = scalar_lea.hbm %s314_s0, 4096  ;;  %s27_s22 = int_to_ptr.hbm [resolvable:$true] %s26_s22 }
   0x6   :  { %s234_s26 = smov [#allocation2 + $0x1]   ;;  %s235_s27 = smov [#allocation5]  }
   0x7   :  { %30 = dma.general %s25_s21, 32768, %s27_s22, %s234_s26, %s235_s27, [#allocation6], %s233_s17, 0  }
   0x8   :  { %s32_s30 = scalar_lea.hbm %s315_s1, 4096  ;;  %s38_s2 = sshll.u32 %s31_s25, 4  ;;  %s39_s2 = int_to_ptr.hbm [resolvable:$true] %s38_s2 }
   0x9   :  { %s40_s3 = sshll.u32 %s32_s30, 4  ;;  %s45_s6 = scalar_lea.hbm %s314_s0, 6144  ;;  %s41_s3 = int_to_ptr.hbm [resolvable:$true] %s40_s3 }
   0xa   :  { %s236_s7 = smov [#allocation2 + $0x2]   ;;  %s237_s8 = smov [#allocation7]  }
   0xb   :  { %44 = dma.general %s39_s2, 32768, %s41_s3, %s236_s7, %s237_s8, [#allocation8], %s233_s17, 0  }
   0xc   :  { %s46_s11 = scalar_lea.hbm %s315_s1, 6144  ;;  %s52_s12 = sshll.u32 %s45_s6, 4  ;;  %s53_s12 = int_to_ptr.hbm [resolvable:$true] %s52_s12 }
   0xd   :  { %s54_s13 = sshll.u32 %s46_s11, 4  ;;  %s59_s16 = scalar_lea.hbm %s314_s0, 8192  ;;  %s55_s13 = int_to_ptr.hbm [resolvable:$true] %s54_s13 }
   0xe   :  { %s238_s18 = smov [#allocation2 + $0x3]   ;;  %s239_s19 = smov [#allocation9]  }
   0xf   :  { %58 = dma.general %s53_s12, 32768, %s55_s13, %s238_s18, %s239_s19, [#allocation10], %s233_s17, 0  }
  0x10   :  { %s60_s22 = scalar_lea.hbm %s315_s1, 8192  ;;  %s66_s23 = sshll.u32 %s59_s16, 4  ;;  %s67_s23 = int_to_ptr.hbm [resolvable:$true] %s66_s23 }
  0x11   :  { %s68_s24 = sshll.u32 %s60_s22, 4  ;;  %s73_s27 = scalar_lea.hbm %s314_s0, 10240  ;;  %s69_s24 = int_to_ptr.hbm [resolvable:$true] %s68_s24 }
  0x12   :  { %s240_s28 = smov [#allocation2 + $0x4]   ;;  %s241_s29 = smov [#allocation11]  }
  0x13   :  { %72 = dma.general %s67_s23, 32768, %s69_s24, %s240_s28, %s241_s29, [#allocation12], %s233_s17, 0  }
  0x14   :  { %s74_s3 = scalar_lea.hbm %s315_s1, 10240  ;;  %s80_s4 = sshll.u32 %s73_s27, 4  ;;  %s81_s4 = int_to_ptr.hbm [resolvable:$true] %s80_s4 }
  0x15   :  { %s82_s5 = sshll.u32 %s74_s3, 4  ;;  %s87_s8 = scalar_lea.hbm %s314_s0, 12288  ;;  %s83_s5 = int_to_ptr.hbm [resolvable:$true] %s82_s5 }
  0x16   :  { %s242_s9 = smov [#allocation2 + $0x5]   ;;  %s243_s10 = smov [#allocation13]  }
  0x17   :  { %86 = dma.general %s81_s4, 32768, %s83_s5, %s242_s9, %s243_s10, [#allocation14], %s233_s17, 0  }
  0x18   :  { %s88_s13 = scalar_lea.hbm %s315_s1, 12288  ;;  %s94_s14 = sshll.u32 %s87_s8, 4  ;;  %s95_s14 = int_to_ptr.hbm [resolvable:$true] %s94_s14 }
  0x19   :  { %s96_s15 = sshll.u32 %s88_s13, 4  ;;  %s101_s19 = scalar_lea.hbm %s314_s0, 14336  ;;  %s97_s15 = int_to_ptr.hbm [resolvable:$true] %s96_s15 }
  0x1a   :  { %s244_s20 = smov [#allocation2 + $0x6]   ;;  %s245_s21 = smov [#allocation15]  }
  0x1b   :  { %100 = dma.general %s95_s14, 32768, %s97_s15, %s244_s20, %s245_s21, [#allocation16], %s233_s17, 0  }
  0x1c   :  { %s102_s24 = scalar_lea.hbm %s315_s1, 14336  ;;  %s108_s25 = sshll.u32 %s101_s19, 4  ;;  %s109_s25 = int_to_ptr.hbm [resolvable:$true] %s108_s25 }
  0x1d   :  { %s110_s26 = sshll.u32 %s102_s24, 4  ;;  %s246_s27 = smov [#allocation2 + $0x7]   ;;  %s111_s26 = int_to_ptr.hbm [resolvable:$true] %s110_s26 }
  0x1e   :  { %s247_s28 = smov [#allocation17]  }
  0x1f   :  { %114 = dma.general %s109_s25, 32768, %s111_s26, %s246_s27, %s247_s28, [#allocation18], %s233_s17, 0  }
  0x20   :  { %215 = dma.done.wait [#allocation2], 32768 }
  0x21   :  { %216 = vsyncadd [#allocation2], 4294934528 }
  0x22   :  { %217 = dma.done.wait [#allocation2 + $0x1], 32768 }
  0x23   :  { %218 = vsyncadd [#allocation2 + $0x1], 4294934528 }
  0x24   :  { %219 = dma.done.wait [#allocation2 + $0x2], 32768 }
  0x25   :  { %220 = vsyncadd [#allocation2 + $0x2], 4294934528 }
  0x26   :  { %221 = dma.done.wait [#allocation2 + $0x3], 32768 }
  0x27   :  { %222 = vsyncadd [#allocation2 + $0x3], 4294934528 }
  0x28   :  { %223 = dma.done.wait [#allocation2 + $0x4], 32768 }
  0x29   :  { %224 = vsyncadd [#allocation2 + $0x4], 4294934528 }
  0x2a   :  { %225 = dma.done.wait [#allocation2 + $0x5], 32768 }
  0x2b   :  { %226 = vsyncadd [#allocation2 + $0x5], 4294934528 }
  0x2c   :  { %227 = dma.done.wait [#allocation2 + $0x6], 32768 }
  0x2d   :  { %228 = vsyncadd [#allocation2 + $0x6], 4294934528 }
  0x2e   :  { %229 = dma.done.wait [#allocation2 + $0x7], 32768 }
  0x2f   :  { %230 = vsyncadd [#allocation2 + $0x7], 4294934528 }
  0x30   :  { %135 = vsyncmov [#allocation2] }
  0x33   :  { %s136_s0 = vpop.sfrf %135 }
  0x34   :  { %p190_p0 = scmp.ne.s32.totalorder %s136_s0, 0 }
  0x36   :  { %140 = shalt.err (%p190_p0)  }
  0x37   :  { %142 = vsyncmov [#allocation2 + $0x1] }
  0x3a   :  { %s143_s1 = vpop.sfrf %142 }
  0x3b   :  { %p191_p1 = scmp.ne.s32.totalorder %s143_s1, 0 }
  0x3d   :  { %147 = shalt.err (%p191_p1)  }
  0x3e   :  { %149 = vsyncmov [#allocation2 + $0x2] }
  0x41   :  { %s150_s17 = vpop.sfrf %149 }
  0x42   :  { %p192_p2 = scmp.ne.s32.totalorder %s150_s17, 0 }
  0x44   :  { %154 = shalt.err (%p192_p2)  }
  0x45   :  { %156 = vsyncmov [#allocation2 + $0x3] }
  0x48   :  { %s157_s29 = vpop.sfrf %156 }
  0x49   :  { %p193_p3 = scmp.ne.s32.totalorder %s157_s29, 0 }
  0x4b   :  { %161 = shalt.err (%p193_p3)  }
  0x4c   :  { %163 = vsyncmov [#allocation2 + $0x4] }
  0x4f   :  { %s164_s30 = vpop.sfrf %163 }
  0x50   :  { %p194_p4 = scmp.ne.s32.totalorder %s164_s30, 0 }
  0x52   :  { %168 = shalt.err (%p194_p4)  }
  0x53   :  { %170 = vsyncmov [#allocation2 + $0x5] }
  0x56   :  { %s171_s2 = vpop.sfrf %170 }
  0x57   :  { %p195_p5 = scmp.ne.s32.totalorder %s171_s2, 0 }
  0x59   :  { %175 = shalt.err (%p195_p5)  }
  0x5a   :  { %177 = vsyncmov [#allocation2 + $0x6] }
  0x5d   :  { %s178_s3 = vpop.sfrf %177 }
  0x5e   :  { %p196_p6 = scmp.ne.s32.totalorder %s178_s3, 0 }
  0x60   :  { %182 = shalt.err (%p196_p6)  }
  0x61   :  { %184 = vsyncmov [#allocation2 + $0x7] }
  0x64   :  { %s185_s4 = vpop.sfrf %184 }
  0x65   :  { %p197_p7 = scmp.ne.s32.totalorder %s185_s4, 0 }
  0x67   :  { %189 = shalt.err (%p197_p7)  }

</bundles_post_ra>
